<compile_context>
chip_gen: v7x
topology: tpu7x:2x2x1
jax: 0.10.0
libtpu: 0.0.40
codegen_flags: <defaults>
</compile_context>

<pallas_src>
import jax
import jax.numpy as jnp
from jax.experimental import pallas as pl
from jax.experimental.pallas import tpu as pltpu

BN_EPS = 1e-5
HID = 64            # hidden width of the module
OUT = 3             # module output width
PAD = 128           # lane-padded width used inside the kernel
NPARAM_ROWS = 16    # packed per-feature parameter rows (full bf16 sublane tile)

# Rows inside the packed parameter block.
ROW_G1, ROW_BT1, ROW_G2, ROW_BT2, ROW_B3 = 0, 1, 2, 3, 4


def mlp_bn_kernel(x_ref, slab_ref, o_ref):
    """Fused forward pass; whole batch + all params resident in VMEM."""
    b, d = x_ref.shape
    inv_b = 1.0 / b  # static batch size

    # Static sublane views into the single parameter slab (zero-cost).
    w1 = slab_ref[0:d, :]                                  # (d, 128)  bf16
    w2 = slab_ref[d:d + PAD, :]                            # (128, 128) bf16
    w3 = slab_ref[d + PAD:d + 2 * PAD, :]                  # (128, 128) bf16
    prm = slab_ref[d + 2 * PAD:d + 2 * PAD + NPARAM_ROWS, :].astype(jnp.float32)

    def bn_relu(h, g_row, bt_row):
        # Training-mode (biased) batch stats, one pass: two back-to-back
        # cross-sublane reduces, then fold affine BN into one scale/shift.
        s1 = jnp.sum(h, axis=0, keepdims=True)
        s2 = jnp.sum(h * h, axis=0, keepdims=True)
        mu = s1 * inv_b
        var = jnp.maximum(s2 * inv_b - mu * mu, 0.0)       # guard cancellation
        g = prm[g_row:g_row + 1, :]
        bt = prm[bt_row:bt_row + 1, :]
        scale = jax.lax.rsqrt(var + BN_EPS) * g
        shift = bt - mu * scale
        return jnp.maximum(h * scale + shift, 0.0)

    # ---- layer1: Linear(input_dim, 64) [bias folded away by BN] + BN + ReLU
    h = jnp.dot(x_ref[...].astype(jnp.bfloat16), w1,
                preferred_element_type=jnp.float32)
    h = bn_relu(h, ROW_G1, ROW_BT1)

    # ---- layer2: Linear(64, 64) [bias folded away by BN] + BN + ReLU
    h = jnp.dot(h.astype(jnp.bfloat16), w2, preferred_element_type=jnp.float32)
    h = bn_relu(h, ROW_G2, ROW_BT2)

    # ---- output_layer: Linear(64, 3), lane-dense (B, 128) store
    out = jnp.dot(h.astype(jnp.bfloat16), w3, preferred_element_type=jnp.float32)
    o_ref[...] = (out + prm[ROW_B3:ROW_B3 + 1, :]).astype(o_ref.dtype)


def init_params(key, input_dim):
    """Deterministic PyTorch-style (uniform fan_in) init; weights stored as
    (in_features, out_features)."""
    def linear(key, fan_in, fan_out):
        k1, k2 = jax.random.split(key)
        bound = 1.0 / jnp.sqrt(fan_in)
        w = jax.random.uniform(k1, (fan_in, fan_out), jnp.float32, -bound, bound)
        b = jax.random.uniform(k2, (1, fan_out), jnp.float32, -bound, bound)
        return w, b

    k1, k2, k3 = jax.random.split(key, 3)
    w1, b1 = linear(k1, input_dim, HID)
    w2, b2 = linear(k2, HID, HID)
    w3, b3 = linear(k3, HID, OUT)
    g1, bt1 = jnp.ones((1, HID), jnp.float32), jnp.zeros((1, HID), jnp.float32)
    g2, bt2 = jnp.ones((1, HID), jnp.float32), jnp.zeros((1, HID), jnp.float32)
    return dict(w1=w1, b1=b1, g1=g1, bt1=bt1,
                w2=w2, b2=b2, g2=g2, bt2=bt2,
                w3=w3, b3=b3)


def pack_kernel_params(params, input_dim):
    """Pack every weight/param into one bf16 slab (single DMA / VMEM buffer).

    b1 / b2 are intentionally omitted: they cancel exactly under training-mode
    BatchNorm. All padded lanes/rows are zero, so padded columns stay exactly 0
    through BN/ReLU and padded rows contribute nothing to the matmuls.
    """
    D = int(input_dim)
    assert D % 8 == 0, "input_dim must be a multiple of 8 for aligned views"
    n_rows = D + 2 * PAD + NPARAM_ROWS
    slab = jnp.zeros((n_rows, PAD), jnp.float32)
    slab = slab.at[0:D, 0:HID].set(params["w1"])
    slab = slab.at[D:D + HID, 0:HID].set(params["w2"])
    slab = slab.at[D + PAD:D + PAD + HID, 0:OUT].set(params["w3"])
    p0 = D + 2 * PAD
    slab = slab.at[p0 + ROW_G1, 0:HID].set(params["g1"][0])
    slab = slab.at[p0 + ROW_BT1, 0:HID].set(params["bt1"][0])
    slab = slab.at[p0 + ROW_G2, 0:HID].set(params["g2"][0])
    slab = slab.at[p0 + ROW_BT2, 0:HID].set(params["bt2"][0])
    slab = slab.at[p0 + ROW_B3, 0:OUT].set(params["b3"][0])
    return slab.astype(jnp.bfloat16)


def neural_network_forward(x, params):
    B, D = x.shape
    slab = pack_kernel_params(params, D)
    vmem = pl.BlockSpec(memory_space=pltpu.MemorySpace.VMEM)
    out_padded = pl.pallas_call(
        mlp_bn_kernel,
        out_shape=jax.ShapeDtypeStruct((B, PAD), jnp.float32),
        in_specs=[vmem, vmem],
        out_specs=vmem,
        compiler_params=pltpu.CompilerParams(vmem_limit_bytes=16 << 20),
    )(x, slab)
    return out_padded[:, :OUT]


def reference_forward(x, params):
    """Exact PyTorch-module semantics (f32, biases included, two-pass BN)."""
    def bn(h, g, bt):
        mu = jnp.mean(h, axis=0, keepdims=True)
        var = jnp.mean((h - mu) ** 2, axis=0, keepdims=True)
        return (h - mu) / jnp.sqrt(var + BN_EPS) * g + bt

    h = jnp.maximum(bn(x @ params["w1"] + params["b1"],
                       params["g1"], params["bt1"]), 0.0)
    h = jnp.maximum(bn(h @ params["w2"] + params["b2"],
                       params["g2"], params["bt2"]), 0.0)
    return h @ params["w3"] + params["b3"]


def reference_forward_bf16(x, params):
    """Same numerics as the kernel: bf16 matmul operands, f32 accumulate/stats."""
    def bn(h, g, bt):
        mu = jnp.mean(h, axis=0, keepdims=True)
        var = jnp.mean((h - mu) ** 2, axis=0, keepdims=True)
        return (h - mu) * jax.lax.rsqrt(var + BN_EPS) * g + bt

    def bdot(a, w):
        return jnp.dot(a.astype(jnp.bfloat16), w.astype(jnp.bfloat16),
                       preferred_element_type=jnp.float32)

    h = jnp.maximum(bn(bdot(x, params["w1"]), params["g1"], params["bt1"]), 0.0)
    h = jnp.maximum(bn(bdot(h, params["w2"]), params["g2"], params["bt2"]), 0.0)
    b3 = params["b3"].astype(jnp.bfloat16).astype(jnp.float32)
    return bdot(h, params["w3"]) + b3


if __name__ == "__main__":
    key = jax.random.PRNGKey(0)
    kx, kp = jax.random.split(key)

    batch = 8
    input_dim = 32
    x = jax.random.normal(kx, (batch, input_dim), jnp.float32)
    params = init_params(kp, input_dim)

    out = jax.block_until_ready(neural_network_forward(x, params))
    assert out.shape == (batch, OUT), out.shape

    # Tight check against a reference with identical numerics (bf16 matmul
    # operands, f32 accumulation / BN statistics).
    ref_bf16 = reference_forward_bf16(x, params)
    err_tight = float(jnp.max(jnp.abs(out - ref_bf16)))
    assert jnp.allclose(out, ref_bf16, atol=5e-3, rtol=5e-3), err_tight

    # Sanity check against exact f32 module semantics; the gap is bounded by
    # bf16 weight/activation quantization of the matmul operands.
    # TODO(synk): BatchNorm1d running_mean/running_var buffer updates (a
    # training-mode side effect of the torch module) are not replicated.
    ref_f32 = reference_forward(x, params)
    err_f32 = float(jnp.max(jnp.abs(out - ref_f32)))
    assert jnp.allclose(out, ref_f32, atol=1e-1, rtol=1e-1), err_f32

    print("KERNEL_OK")
</pallas_src>

<mosaic_0001>
module attributes {stable_mosaic.version = 11 : i64} {
  func.func @mlp_bn_kernel(%arg0: memref<8x32xf32, #tpu.memory_space<vmem>>, %arg1: memref<304x128xbf16, #tpu.memory_space<vmem>>, %arg2: memref<8x128xf32, #tpu.memory_space<vmem>>) attributes {dimension_semantics = [], scalar_prefetch = 0 : i64, scratch_operands = 0 : i64, tpu.core_type = #tpu.core_type<tc>} {
    %c0 = arith.constant 0 : index
    %c0_0 = arith.constant 0 : index
    %0 = vector.load %arg1[%c0, %c0_0] : memref<304x128xbf16, #tpu.memory_space<vmem>>, vector<32x128xbf16>
    %c32 = arith.constant 32 : index
    %c0_1 = arith.constant 0 : index
    %1 = vector.load %arg1[%c32, %c0_1] : memref<304x128xbf16, #tpu.memory_space<vmem>>, vector<128x128xbf16>
    %c160 = arith.constant 160 : index
    %c0_2 = arith.constant 0 : index
    %2 = vector.load %arg1[%c160, %c0_2] : memref<304x128xbf16, #tpu.memory_space<vmem>>, vector<128x128xbf16>
    %c288 = arith.constant 288 : index
    %c0_3 = arith.constant 0 : index
    %3 = vector.load %arg1[%c288, %c0_3] : memref<304x128xbf16, #tpu.memory_space<vmem>>, vector<16x128xbf16>
    %4 = arith.extf %3 : vector<16x128xbf16> to vector<16x128xf32>
    %c0_4 = arith.constant 0 : index
    %c0_5 = arith.constant 0 : index
    %5 = vector.load %arg0[%c0_4, %c0_5] : memref<8x32xf32, #tpu.memory_space<vmem>>, vector<8x32xf32>
    %6 = arith.truncf %5 : vector<8x32xf32> to vector<8x32xbf16>
    %cst = arith.constant dense<0.000000e+00> : vector<8x128xf32>
    %7 = tpu.matmul %6, %0, %cst {dimension_numbers = #tpu.dot_dimension_numbers<[1], [0], [0], [1], [0, 0, 1, 1], [], []>} : vector<8x32xbf16>, vector<32x128xbf16>, vector<8x128xf32> -> vector<8x128xf32>
    %cst_6 = arith.constant dense<0.000000e+00> : vector<128xf32>
    %8 = vector.multi_reduction <add>, %7, %cst_6 [0] : vector<8x128xf32> to vector<128xf32>
    %9 = vector.shape_cast %8 : vector<128xf32> to vector<1x128xf32>
    %10 = arith.mulf %7, %7 : vector<8x128xf32>
    %cst_7 = arith.constant dense<0.000000e+00> : vector<128xf32>
    %11 = vector.multi_reduction <add>, %10, %cst_7 [0] : vector<8x128xf32> to vector<128xf32>
    %12 = vector.shape_cast %11 : vector<128xf32> to vector<1x128xf32>
    %cst_8 = arith.constant 1.250000e-01 : f32
    %13 = vector.broadcast %cst_8 : f32 to vector<1x128xf32>
    %14 = arith.mulf %9, %13 : vector<1x128xf32>
    %cst_9 = arith.constant 1.250000e-01 : f32
    %15 = vector.broadcast %cst_9 : f32 to vector<1x128xf32>
    %16 = arith.mulf %12, %15 : vector<1x128xf32>
    %17 = arith.mulf %14, %14 : vector<1x128xf32>
    %18 = arith.subf %16, %17 : vector<1x128xf32>
    %cst_10 = arith.constant 0.000000e+00 : f32
    %19 = vector.broadcast %cst_10 : f32 to vector<1x128xf32>
    %20 = arith.maximumf %18, %19 : vector<1x128xf32>
    %21 = vector.extract_strided_slice %4 {offsets = [0, 0], sizes = [1, 128], strides = [1, 1]} : vector<16x128xf32> to vector<1x128xf32>
    %22 = vector.extract_strided_slice %4 {offsets = [1, 0], sizes = [1, 128], strides = [1, 1]} : vector<16x128xf32> to vector<1x128xf32>
    %cst_11 = arith.constant 9.99999974E-6 : f32
    %23 = vector.broadcast %cst_11 : f32 to vector<1x128xf32>
    %24 = arith.addf %20, %23 : vector<1x128xf32>
    %25 = math.rsqrt %24 : vector<1x128xf32>
    %26 = arith.mulf %25, %21 : vector<1x128xf32>
    %27 = arith.mulf %14, %26 : vector<1x128xf32>
    %28 = arith.subf %22, %27 : vector<1x128xf32>
    %29 = vector.broadcast %26 : vector<1x128xf32> to vector<8x128xf32>
    %30 = arith.mulf %7, %29 : vector<8x128xf32>
    %31 = vector.broadcast %28 : vector<1x128xf32> to vector<8x128xf32>
    %32 = arith.addf %30, %31 : vector<8x128xf32>
    %cst_12 = arith.constant 0.000000e+00 : f32
    %33 = vector.broadcast %cst_12 : f32 to vector<8x128xf32>
    %34 = arith.maximumf %32, %33 : vector<8x128xf32>
    %35 = arith.truncf %34 : vector<8x128xf32> to vector<8x128xbf16>
    %cst_13 = arith.constant dense<0.000000e+00> : vector<8x128xf32>
    %36 = tpu.matmul %35, %1, %cst_13 {dimension_numbers = #tpu.dot_dimension_numbers<[1], [0], [0], [1], [0, 0, 1, 1], [], []>} : vector<8x128xbf16>, vector<128x128xbf16>, vector<8x128xf32> -> vector<8x128xf32>
    %cst_14 = arith.constant dense<0.000000e+00> : vector<128xf32>
    %37 = vector.multi_reduction <add>, %36, %cst_14 [0] : vector<8x128xf32> to vector<128xf32>
    %38 = vector.shape_cast %37 : vector<128xf32> to vector<1x128xf32>
    %39 = arith.mulf %36, %36 : vector<8x128xf32>
    %cst_15 = arith.constant dense<0.000000e+00> : vector<128xf32>
    %40 = vector.multi_reduction <add>, %39, %cst_15 [0] : vector<8x128xf32> to vector<128xf32>
    %41 = vector.shape_cast %40 : vector<128xf32> to vector<1x128xf32>
    %cst_16 = arith.constant 1.250000e-01 : f32
    %42 = vector.broadcast %cst_16 : f32 to vector<1x128xf32>
    %43 = arith.mulf %38, %42 : vector<1x128xf32>
    %cst_17 = arith.constant 1.250000e-01 : f32
    %44 = vector.broadcast %cst_17 : f32 to vector<1x128xf32>
    %45 = arith.mulf %41, %44 : vector<1x128xf32>
    %46 = arith.mulf %43, %43 : vector<1x128xf32>
    %47 = arith.subf %45, %46 : vector<1x128xf32>
    %cst_18 = arith.constant 0.000000e+00 : f32
    %48 = vector.broadcast %cst_18 : f32 to vector<1x128xf32>
    %49 = arith.maximumf %47, %48 : vector<1x128xf32>
    %50 = vector.extract_strided_slice %4 {offsets = [2, 0], sizes = [1, 128], strides = [1, 1]} : vector<16x128xf32> to vector<1x128xf32>
    %51 = vector.extract_strided_slice %4 {offsets = [3, 0], sizes = [1, 128], strides = [1, 1]} : vector<16x128xf32> to vector<1x128xf32>
    %cst_19 = arith.constant 9.99999974E-6 : f32
    %52 = vector.broadcast %cst_19 : f32 to vector<1x128xf32>
    %53 = arith.addf %49, %52 : vector<1x128xf32>
    %54 = math.rsqrt %53 : vector<1x128xf32>
    %55 = arith.mulf %54, %50 : vector<1x128xf32>
    %56 = arith.mulf %43, %55 : vector<1x128xf32>
    %57 = arith.subf %51, %56 : vector<1x128xf32>
    %58 = vector.broadcast %55 : vector<1x128xf32> to vector<8x128xf32>
    %59 = arith.mulf %36, %58 : vector<8x128xf32>
    %60 = vector.broadcast %57 : vector<1x128xf32> to vector<8x128xf32>
    %61 = arith.addf %59, %60 : vector<8x128xf32>
    %cst_20 = arith.constant 0.000000e+00 : f32
    %62 = vector.broadcast %cst_20 : f32 to vector<8x128xf32>
    %63 = arith.maximumf %61, %62 : vector<8x128xf32>
    %64 = arith.truncf %63 : vector<8x128xf32> to vector<8x128xbf16>
    %cst_21 = arith.constant dense<0.000000e+00> : vector<8x128xf32>
    %65 = tpu.matmul %64, %2, %cst_21 {dimension_numbers = #tpu.dot_dimension_numbers<[1], [0], [0], [1], [0, 0, 1, 1], [], []>} : vector<8x128xbf16>, vector<128x128xbf16>, vector<8x128xf32> -> vector<8x128xf32>
    %66 = vector.extract_strided_slice %4 {offsets = [4, 0], sizes = [1, 128], strides = [1, 1]} : vector<16x128xf32> to vector<1x128xf32>
    %67 = vector.broadcast %66 : vector<1x128xf32> to vector<8x128xf32>
    %68 = arith.addf %65, %67 : vector<8x128xf32>
    %c0_22 = arith.constant 0 : index
    %c0_23 = arith.constant 0 : index
    %69 = vector.load %arg2[%c0_22, %c0_23] : memref<8x128xf32, #tpu.memory_space<vmem>>, vector<8x128xf32>
    tpu.vector_store %arg2[%c0_22, %c0_23], %68 {strides = array<i32>} : memref<8x128xf32, #tpu.memory_space<vmem>>, vector<8x128xf32>,
    return
  }
}

</mosaic_0001>

<bundles_post_ra>
// kernel: tpu_custom_call.1
= control target key start
LH: loop header
LB: loop body
LE: loop exit
PB: predicated region body
PF: predicated region fallthrough
CT: control target
= control target key end

     0   :  { %7 = vsyncpa [#allocation3], 0  ;;  %s697_s0 = inlined_call_operand.hbm [shape: f32[8,32], index: 0, kind: input, shape index: {}]   ;;  %s698_s1 = inlined_call_operand.hbm [shape: bf16[304,128], index: 1, kind: input, shape index: {}]   ;;  %s699_s2 = inlined_call_operand.hbm [shape: f32[8,128], index: 2, kind: output, shape index: {}]  }
   0x1   :  { %8 = vsyncpa [#allocation6], 0 }
   0x2   :  { %9 = vsyncpa [#allocation4], 0  ;;  %s597_s9 = smov [#allocation2]   ;;  %s598_s11 = smov [#allocation5]  }
   0x3   :  { %s16_s10 = sshll.u32 %s597_s9, 4  ;;  %s25_s12 = sshll.u32 %s598_s11, 4  ;;  %s17_s10 = int_to_ptr.vmem [resolvable:$true] %s16_s10  ;;  %s619_s12 = int_to_ptr.vmem [resolvable:$true] %s25_s12 }
   0x4   :  { %s525_s15 = scalar_lea.hbm %s697_s0, 128 }
   0x5   :  { %p526_p0 = scmp.ne.s32.totalorder %s697_s0, %s525_s15  ;;  %p529_p1 = scmp.lt.u32.totalorder %s525_s15, %s697_s0 }
   0x7   :  { %p531_p2 = pnand %p529_p1, %p526_p0 }
   0x9   :  { %534 = shalt.err (!%p531_p2)
}
   0xa   :  { %s535_s20 = scalar_lea.vmem %s17_s10, 128  ;;  %p540_p4 = scmp.lt.s32.totalorder %s17_s10, %s17_s10 }
   0xb   :  { %p536_p3 = scmp.ne.s32.totalorder %s17_s10, %s535_s20  ;;  %p541_p5 = scmp.lt.s32.totalorder %s535_s20, %s535_s20 }
   0xd   :  { %p542_p6 = por %p541_p5, %p540_p4 }
   0xf   :  { %p543_p7 = pnand %p542_p6, %p536_p3 }
  0x11   :  { %546 = shalt.err (!%p543_p7)
}
  0x12   :  { %19 = dma.hbm_to_vmem [thread:$0]  %s697_s0, 128, %s17_s10, [#allocation3]  }
  0x13   :  { %s547_s25 = scalar_lea.hbm %s698_s1, 2432 }
  0x14   :  { %p548_p8 = scmp.ne.s32.totalorder %s698_s1, %s547_s25  ;;  %p551_p9 = scmp.lt.u32.totalorder %s547_s25, %s698_s1 }
  0x16   :  { %p553_p10 = pnand %p551_p9, %p548_p8 }
  0x18   :  { %556 = shalt.err (!%p553_p10)
}
  0x19   :  { %s557_s30 = scalar_lea.vmem %s619_s12, 2432  ;;  %p562_p12 = scmp.lt.s32.totalorder %s619_s12, %s619_s12 }
  0x1a   :  { %p558_p11 = scmp.ne.s32.totalorder %s619_s12, %s557_s30  ;;  %p563_p13 = scmp.lt.s32.totalorder %s557_s30, %s557_s30 }
  0x1c   :  { %p564_p0 = por %p563_p13, %p562_p12 }
  0x1e   :  { %p565_p1 = pnand %p564_p0, %p558_p11 }
  0x20   :  { %568 = shalt.err (!%p565_p1)
}
  0x21   :  { %s599_s0 = smov 64   ;;  %s600_s3 = smov 4  }
  0x22   :  { %31 = dma.hbm_to_vmem [thread:$0]  %s698_s1, 2432, %s619_s12, [#allocation6], %s599_s0, %s599_s0, %s600_s3  }
  0x23   :  { %591 = dma.done.wait [#allocation3], 128  }
  0x24   :  { %592 = vsyncadd [#allocation3], 4294967168 }
  0x25   :  { %593 = dma.done.wait [#allocation6], 2432  }
  0x26   :  { %594 = vsyncadd [#allocation6], 4294964864  ;;  %v601_v0 = vmov 0.0   ;;  %vm602_vm0 = vmmov 0   ;;  %v503_v1 = vld [vmem:[#allocation5] sm:$0xff]   ;;  %v504_v2 = vld [vmem:[#allocation5 + $0x8] sm:$0xff]   ;;  %v161_v36 = vlaneseq }
  0x27   :  { %448 = vmatprep.subr.bf16.mxu0 %v601_v0  ;;  %452 = vmatprep.mubr.msk.bf16.mxu0 %vm602_vm0, %v601_v0  ;;  %v77_v3 = vld [vmem:[#allocation2] sm:$0xff]  ;;  %vm91_vm1 = vcmask 261120   ;;  %v505_v5 = vld [vmem:[#allocation5 + $0x10] sm:$0xff]   ;;  %v507_v7 = vld [vmem:[#allocation5 + $0x20] sm:$0xff]   ;;  %s603_s1 = smov [#allocation7]  }
  0x28   :  { %456 = vmatprep.subr.bf16.mxu1 %v601_v0  ;;  %472 = vmatprep.mubr.msk.bf16.mxu1 %vm602_vm0, %v601_v0  ;;  %v78_v4 = vpack.c.bf16 %v77_v3, %v77_v3  ;;  %v506_v6 = vld [vmem:[#allocation5 + $0x18] sm:$0xff]   ;;  %v508_v8 = vld [vmem:[#allocation5 + $0x28] sm:$0xff]   ;;  %v509_v9 = vld [vmem:[#allocation5 + $0x30] sm:$0xff]   ;;  %v666_v39 = vshrl.u32 %v161_v36, 7  ;;  %s398_s6 = sshll.u32 %s603_s1, 4  ;;  %s399_s6 = int_to_ptr.vmem [resolvable:$true] %s398_s6 }
  0x29   :  { %449 = vmatpush3.bf16.msra.mxu0 %v503_v1  ;;  %457 = vmatpush3.bf16.msra.mxu1 %v505_v5  ;;  %v510_v10 = vld [vmem:[#allocation5 + $0x38] sm:$0xff]   ;;  %v511_v11 = vld [vmem:[#allocation5 + $0x40] sm:$0xff]   ;;  %v512_v12 = vld [vmem:[#allocation5 + $0x48] sm:$0xff]   ;;  %s569_s7 = scalar_lea.vmem %s399_s6, 128  ;;  %p574_p3 = scmp.lt.s32.totalorder %s399_s6, %s399_s6 }
  0x2a   :  { %450 = vmatprep.subr.bf16.mxu0 %v601_v0  ;;  %458 = vmatprep.subr.bf16.mxu1 %v601_v0  ;;  %v75_v37 = vld [vmem:[#allocation5 + $0x90] sm:$0xf]  ;;  %v163_v42 = vsub.s32 0, %v666_v39  ;;  %v168_v46 = vsub.s32 1, %v666_v39  ;;  %v514_v54 = vld [vmem:[#allocation5 + $0x58] sm:$0xff]   ;;  %v515_v55 = vld [vmem:[#allocation5 + $0x60] sm:$0xff]   ;;  %p570_p2 = scmp.ne.s32.totalorder %s399_s6, %s569_s7  ;;  %p575_p4 = scmp.lt.s32.totalorder %s569_s7, %s569_s7 }
  0x2b   :  { %v664_v38 = vunpack.c.l.bf16 %v75_v37  ;;  %v513_v53 = vld [vmem:[#allocation5 + $0x50] sm:$0xff]   ;;  %v516_v56 = vld [vmem:[#allocation5 + $0x68] sm:$0xff]   ;;  %v518_v58 = vld [vmem:[#allocation5 + $0x78] sm:$0xff]  }
  0x2c   :  { %v517_v57 = vld [vmem:[#allocation5 + $0x70] sm:$0xff]   ;;  %v519_v59 = vld [vmem:[#allocation5 + $0x80] sm:$0xff]   ;;  %v520_v60 = vld [vmem:[#allocation5 + $0x88] sm:$0xff]   ;;  %p576_p5 = por %p575_p4, %p574_p3 }
  0x2d   :  { %451 = vmatpush3.bf16.msra.mxu0 %v504_v2  ;;  %459 = vmatpush3.bf16.msra.mxu1 %v506_v6 }
  0x2e   :  { %476 = vmatprep.subr.bf16.mxu0 %v601_v0  ;;  %460 = vmatprep.subr.bf16.mxu1 %v601_v0  ;;  %p577_p6 = pnand %p576_p5, %p570_p2 }
  0x30   :  { %453 = vmatmul.mubr.msk.bf16.vlgmr.msra.gmra.mrb[0].mxu0 %vm91_vm1, %v78_v4 }
  0x31   :  { %492 = vmatprep.mubr.msk.bf16.mxu0 %vm602_vm0, %v601_v0  ;;  %461 = vmatpush3.bf16.msra.mxu1 %v507_v7 }
  0x32   :  { %462 = vmatprep.subr.bf16.mxu1 %v601_v0  ;;  %477 = vmatpush3.bf16.msra.mxu0 %v513_v53 }
  0x33   :  { %478 = vmatprep.subr.bf16.mxu0 %v601_v0 }
  0x35   :  { %463 = vmatpush3.bf16.msra.mxu1 %v508_v8 }
  0x36   :  { %464 = vmatprep.subr.bf16.mxu1 %v601_v0  ;;  %479 = vmatpush3.bf16.msra.mxu0 %v514_v54 }
  0x37   :  { %480 = vmatprep.subr.bf16.mxu0 %v601_v0 }
  0x39   :  { %465 = vmatpush3.bf16.msra.mxu1 %v509_v9 }
  0x3a   :  { %466 = vmatprep.subr.bf16.mxu1 %v601_v0  ;;  %481 = vmatpush3.bf16.msra.mxu0 %v515_v55 }
  0x3b   :  { %482 = vmatprep.subr.bf16.mxu0 %v601_v0 }
  0x3d   :  { %467 = vmatpush3.bf16.msra.mxu1 %v510_v10 }
  0x3e   :  { %468 = vmatprep.subr.bf16.mxu1 %v601_v0  ;;  %483 = vmatpush3.bf16.msra.mxu0 %v516_v56 }
  0x3f   :  { %484 = vmatprep.subr.bf16.mxu0 %v601_v0 }
  0x41   :  { %469 = vmatpush3.bf16.msra.mxu1 %v511_v11 }
  0x42   :  { %470 = vmatprep.subr.bf16.mxu1 %v601_v0  ;;  %485 = vmatpush3.bf16.msra.mxu0 %v517_v57 }
  0x43   :  { %486 = vmatprep.subr.bf16.mxu0 %v601_v0 }
  0x45   :  { %471 = vmatpush3.bf16.msra.mxu1 %v512_v12 }
  0x46   :  { %487 = vmatpush3.bf16.msra.mxu0 %v518_v58 }
  0x47   :  { %488 = vmatprep.subr.bf16.mxu0 %v601_v0 }
  0x4a   :  { %489 = vmatpush3.bf16.msra.mxu0 %v519_v59 }
  0x4b   :  { %490 = vmatprep.subr.bf16.mxu0 %v601_v0 }
  0x4e   :  { %491 = vmatpush3.bf16.msra.mxu0 %v520_v60 }
 0x103   :  { %v129_v13 = vpop.f32.mrb[0].mxu0 }
 0x104   :  { %v135_v14 = vrot.slane %v129_v13, 4  ;;  %v141_v15 = vmul.f32 %v129_v13, %v129_v13  ;;  %v454_v16 = vpop.f32.mrb[1].mxu0 }
 0x105   :  { %v132_v17 = vpop.f32.mrb[2].mxu0 }
 0x106   :  { %v136_v18 = vadd.f32 %v135_v14, %v129_v13  ;;  %v142_v19 = vrot.slane %v141_v15, 4  ;;  %v455_v20 = vpop.f32.mrb[3].mxu0 }
 0x108   :  { %v137_v21 = vrot.slane %v136_v18, 2  ;;  %v143_v22 = vadd.f32 %v142_v19, %v141_v15 }
 0x10a   :  { %v138_v23 = vadd.f32 %v137_v21, %v136_v18  ;;  %v144_v24 = vrot.slane %v143_v22, 2 }
 0x10c   :  { %v139_v25 = vrot.slane %v138_v23, 1  ;;  %v145_v26 = vadd.f32 %v144_v24, %v143_v22  ;;  %v289_v22 = vsub.s32 2, %v666_v39 }
 0x10e   :  { %v140_v27 = vadd.f32 %v139_v25, %v138_v23  ;;  %v146_v28 = vrot.slane %v145_v26, 1 }
 0x110   :  { %v147_v29 = vadd.f32 %v146_v28, %v145_v26  ;;  %v148_v30 = vmul.f32 0.125, %v140_v27  ;;  %v294_v26 = vsub.s32 3, %v666_v39 }
 0x112   :  { %v149_v31 = vmul.f32 0.125, %v147_v29  ;;  %v150_v32 = vmul.f32 %v148_v30, %v148_v30 }
 0x114   :  { %v151_v33 = vsub.f32 %v149_v31, %v150_v32 }
 0x116   :  { %v152_v34 = vmax.f32 %v151_v33, 0.0  ;;  %v301_v33 = vsub.s32 4, %v666_v39 }
 0x118   :  { %v153_v35 = vadd.f32 1e-05, %v152_v34  ;;  %v302_v34 = vrot.slane %v664_v38, %v301_v33 }
 0x11a   :  { %521 = vrsqrt.f32 %v153_v35 }
 0x124   :  { %v522_v40 = vpop.eup %521 }
 0x125   :  { %v155_v41 = vmul.f32 %v522_v40, %v664_v38 }
 0x127   :  { %v156_v43 = vmul.f32 %v155_v41, %v148_v30  ;;  %v164_v44 = vrot.slane %v155_v41, %v163_v42 }
 0x129   :  { %v158_v45 = vrot.slane %v156_v43, 7  ;;  %v165_v48 = vmul.f32 %v164_v44, %v129_v13 }
 0x12b   :  { %v160_v47 = vsub.f32 %v664_v38, %v158_v45 }
 0x12d   :  { %v169_v49 = vrot.slane %v160_v47, %v168_v46 }
 0x12f   :  { %v170_v50 = vadd.f32 %v169_v49, %v165_v48 }
 0x131   :  { %v171_v51 = vmax.f32 %v170_v50, 0.0 }
 0x133   :  { %v172_v52 = vpack.c.bf16 %v171_v51, %v171_v51 }
 0x135   :  { %473 = vmatmul.mubr.bf16.vlgmr.msra.gmra.mrb[0].mxu1 %v172_v52 }
 0x208   :  { %v255_v61 = vpop.f32.mrb[0].mxu1 }
 0x209   :  { %v261_v62 = vrot.slane %v255_v61, 4  ;;  %v267_v63 = vmul.f32 %v255_v61, %v255_v61  ;;  %v474_v1 = vpop.f32.mrb[1].mxu1 }
 0x20a   :  { %v258_v2 = vpop.f32.mrb[2].mxu1 }
 0x20b   :  { %v262_v3 = vadd.f32 %v261_v62, %v255_v61  ;;  %v268_v4 = vrot.slane %v267_v63, 4  ;;  %v475_v5 = vpop.f32.mrb[3].mxu1 }
 0x20d   :  { %v263_v6 = vrot.slane %v262_v3, 2  ;;  %v269_v7 = vadd.f32 %v268_v4, %v267_v63 }
 0x20f   :  { %v264_v8 = vadd.f32 %v263_v6, %v262_v3  ;;  %v270_v9 = vrot.slane %v269_v7, 2 }
 0x211   :  { %v265_v10 = vrot.slane %v264_v8, 1  ;;  %v271_v11 = vadd.f32 %v270_v9, %v269_v7 }
 0x213   :  { %v266_v12 = vadd.f32 %v265_v10, %v264_v8  ;;  %v272_v13 = vrot.slane %v271_v11, 1 }
 0x215   :  { %v273_v14 = vadd.f32 %v272_v13, %v271_v11  ;;  %v274_v0 = vmul.f32 0.125, %v266_v12 }
 0x217   :  { %v275_v15 = vmul.f32 0.125, %v273_v14  ;;  %v276_v16 = vmul.f32 %v274_v0, %v274_v0 }
 0x219   :  { %v277_v17 = vsub.f32 %v275_v15, %v276_v16 }
 0x21b   :  { %v278_v18 = vmax.f32 %v277_v17, 0.0 }
 0x21d   :  { %v279_v19 = vadd.f32 1e-05, %v278_v18 }
 0x21f   :  { %523 = vrsqrt.f32 %v279_v19 }
 0x229   :  { %v524_v20 = vpop.eup %523 }
 0x22a   :  { %v281_v21 = vmul.f32 %v524_v20, %v664_v38 }
 0x22c   :  { %v282_v23 = vmul.f32 %v281_v21, %v274_v0  ;;  %v290_v25 = vrot.slane %v281_v21, %v289_v22 }
 0x22e   :  { %v284_v24 = vrot.slane %v282_v23, 7  ;;  %v291_v28 = vmul.f32 %v290_v25, %v255_v61 }
 0x230   :  { %v286_v27 = vsub.f32 %v664_v38, %v284_v24 }
 0x232   :  { %v295_v29 = vrot.slane %v286_v27, %v294_v26 }
 0x234   :  { %v296_v30 = vadd.f32 %v295_v29, %v291_v28 }
 0x236   :  { %v297_v31 = vmax.f32 %v296_v30, 0.0 }
 0x238   :  { %v298_v32 = vpack.c.bf16 %v297_v31, %v297_v31 }
 0x23a   :  { %493 = vmatmul.mubr.bf16.vlgmr.msra.gmra.mrb[4].mxu0 %v298_v32 }
 0x30d   :  { %v385_v35 = vpop.f32.mrb[4].mxu0 }
 0x30e   :  { %v386_v36 = vadd.f32 %v385_v35, %v302_v34  ;;  %v494_v37 = vpop.f32.mrb[5].mxu0 }
 0x30f   :  { %v388_v40 = vpop.f32.mrb[6].mxu0 }
 0x310   :  { %391 = vst [vmem:[#allocation7] sm:$0xff] %v386_v36  ;;  %v495_v41 = vpop.f32.mrb[7].mxu0 }
 0x311   :  { %580 = shalt.err (!%p577_p6)
}
 0x312   :  { %s581_s10 = scalar_lea.hbm %s699_s2, 128 }
 0x313   :  { %p582_p7 = scmp.ne.s32.totalorder %s699_s2, %s581_s10  ;;  %p585_p8 = scmp.lt.u32.totalorder %s581_s10, %s699_s2 }
 0x315   :  { %p587_p9 = pnand %p585_p8, %p582_p7 }
 0x317   :  { %590 = shalt.err (!%p587_p9)
}
 0x318   :  { %401 = dma.vmem_to_hbm [thread:$0]  %s399_s6, 128, %s699_s2, [#allocation4]  }
 0x319   :  { %595 = dma.done.wait [#allocation4], 128  }
 0x31a   :  { %596 = vsyncadd [#allocation4], 4294967168 }
 0x31b   :  { %405 = vsyncpa [#allocation3], 1 }
 0x31c   :  { %406 = vsyncpa [#allocation6], 1 }
 0x31d   :  { %407 = vsyncpa [#allocation4], 1 }

</bundles_post_ra>
